<compile_context>
chip_gen: v7x
topology: tpu7x:2x2x1
jax: 0.10.0
libtpu: 0.0.40
codegen_flags: <defaults>
</compile_context>

<pallas_src>
import functools

import jax
import jax.numpy as jnp
from jax.experimental import pallas as pl
from jax.experimental.pallas import tpu as pltpu


def _round_down(a, b):
    return (a // b) * b


def _circular_embedding_kernel(x_ref, wb_ref, b_ref, o_ref, *, use_circ):
    """x_ref: [tm, F]; wb_ref: [K, out]; b_ref: [1, out]; o_ref: [tm, out]."""
    x = x_ref[...].astype(jnp.float32)                        # [tm, F]
    if use_circ:
        # Full-width sin/cos: same vregs as the phi columns, zero weight rows
        # cancel the non-circular contributions -> no lane gather needed.
        feats = jnp.concatenate([x, jnp.sin(x), jnp.cos(x)], axis=1)   # [tm, 3F]
    else:
        feats = x                                              # plain Linear
    acc = jnp.dot(feats, wb_ref[...].astype(jnp.float32),
                  preferred_element_type=jnp.float32)          # [tm, out]
    acc = acc + b_ref[...].astype(jnp.float32)                 # bias broadcast
    o_ref[...] = acc.astype(o_ref.dtype)


@functools.partial(jax.jit, static_argnames=("circular_indices", "tm"))
def circular_embedding(x, weight_t, bias, *, circular_indices=None, tm=4096):
    """x: [B, N, F]; weight_t: [F + len(circ), out] (pre-transposed W.T); bias: [out]."""
    B, N, F = x.shape
    circ = tuple(circular_indices) if circular_indices else ()
    C = len(circ)
    remaining = tuple(i for i in range(F) if i not in circ)
    R = len(remaining)
    out_features = weight_t.shape[1]
    use_circ = C > 0

    # --- Fold column permutation + circular selection into one packed weight.
    # Torch concat layout is [remaining | sin(circ) | cos(circ)], so weight_t
    # rows are [W_rem (R) | W_sin (C) | W_cos (C)].
    w_dtype = weight_t.dtype
    w_x = jnp.zeros((F, out_features), w_dtype)
    if R > 0:
        w_x = w_x.at[jnp.array(remaining, jnp.int32)].set(weight_t[:R])
    if use_circ:
        circ_idx = jnp.array(circ, jnp.int32)
        w_sin = jnp.zeros((F, out_features), w_dtype).at[circ_idx].set(
            weight_t[R:R + C])
        w_cos = jnp.zeros((F, out_features), w_dtype).at[circ_idx].set(
            weight_t[R + C:R + 2 * C])
        wb = jnp.concatenate([w_x, w_sin, w_cos], axis=0)     # [3F, out]
    else:
        wb = w_x                                               # [F, out]
    K = wb.shape[0]
    bias2d = bias.reshape(1, out_features)

    # --- Row tiling: big tiles, VMEM-capped, multiple of 8 sublanes.
    x_flat = x.reshape(B * N, F)
    M = B * N
    bytes_per_row = 4 * (F + out_features)                     # in + out, f32
    tm_cap = max(8, _round_down((16 * 1024 * 1024) // (2 * bytes_per_row), 8))
    tm_eff = min(tm, tm_cap)
    if M <= tm_eff:
        tm_eff = M                                             # single full block
    grid = (pl.cdiv(M, tm_eff),)

    kernel = functools.partial(_circular_embedding_kernel, use_circ=use_circ)

    cost = pl.CostEstimate(
        flops=2 * M * K * out_features,
        transcendentals=2 * M * F if use_circ else 0,
        bytes_accessed=4 * (M * F + M * out_features + K * out_features
                            + out_features),
    )

    out = pl.pallas_call(
        kernel,
        out_shape=jax.ShapeDtypeStruct((M, out_features), x.dtype),
        grid_spec=pltpu.PrefetchScalarGridSpec(
            num_scalar_prefetch=0,
            grid=grid,
            in_specs=[
                pl.BlockSpec((tm_eff, F), lambda i: (i, 0)),
                pl.BlockSpec((K, out_features), lambda i: (0, 0)),
                pl.BlockSpec((1, out_features), lambda i: (0, 0)),
            ],
            out_specs=pl.BlockSpec((tm_eff, out_features), lambda i: (i, 0)),
        ),
        compiler_params=pltpu.CompilerParams(
            dimension_semantics=("parallel",),
            vmem_limit_bytes=32 * 1024 * 1024,
        ),
        cost_estimate=cost,
    )(x_flat, wb, bias2d)

    return out.reshape(B, N, out_features)


def _reference(x, weight_t, bias, circular_indices):
    circ = list(circular_indices)
    F = x.shape[-1]
    remaining = [i for i in range(F) if i not in circ]
    xc = x[..., jnp.array(circ)]
    xr = x[..., jnp.array(remaining)]
    feats = jnp.concatenate([xr, jnp.sin(xc), jnp.cos(xc)], axis=-1)
    return feats @ weight_t + bias


if __name__ == "__main__":
    # Small shapes consistent with the module: [B, N, in_features]
    B, N, in_features, out_features = 2, 8, 6, 32
    circular_indices = (2, 5)          # raw phi columns
    in_total = in_features + len(circular_indices)

    key = jax.random.PRNGKey(0)
    kx, kw, kb = jax.random.split(key, 3)

    x = jax.random.normal(kx, (B, N, in_features), dtype=jnp.float32)

    # Deterministic nn.Linear-style init (uniform in +-1/sqrt(fan_in)).
    bound = 1.0 / (in_total ** 0.5)
    # weight stored pre-transposed: [in_total, out_features]
    weight_t = jax.random.uniform(kw, (in_total, out_features), jnp.float32,
                                  -bound, bound)
    bias = jax.random.uniform(kb, (out_features,), jnp.float32, -bound, bound)
    # embed_act=None, dropout=0.0 (module defaults) -> identity.

    out = circular_embedding(x, weight_t, bias,
                             circular_indices=circular_indices)
    out = jax.block_until_ready(out)

    ref = _reference(x, weight_t, bias, circular_indices)
    assert out.shape == (B, N, out_features)
    assert jnp.allclose(out, ref, atol=1e-5, rtol=1e-5), "mismatch vs reference"

    print("KERNEL_OK")
</pallas_src>

<mosaic_0001>
module attributes {stable_mosaic.version = 11 : i64} {
  func.func @_circular_embedding_kernel(%arg0: i32, %arg1: memref<16x6xf32, #tpu.memory_space<vmem>>, %arg2: memref<18x32xf32, #tpu.memory_space<vmem>>, %arg3: memref<1x32xf32, #tpu.memory_space<vmem>>, %arg4: memref<16x32xf32, #tpu.memory_space<vmem>>) attributes {dimension_semantics = [#tpu.dimension_semantics<parallel>], iteration_bounds = array<i64: 1>, scalar_prefetch = 0 : i64, scratch_operands = 0 : i64, tpu.core_type = #tpu.core_type<tc>, window_params = [{transform_indices = @transform_0, window_bounds = array<i64: 16, 6>}, {pipeline_mode = #tpu.pipeline_mode<synchronous>, transform_indices = @transform_1, window_bounds = array<i64: 18, 32>}, {pipeline_mode = #tpu.pipeline_mode<synchronous>, transform_indices = @transform_2, window_bounds = array<i64: 1, 32>}, {transform_indices = @transform_3, window_bounds = array<i64: 16, 32>}]} {
    %c0 = arith.constant 0 : index
    %c0_0 = arith.constant 0 : index
    %0 = vector.load %arg1[%c0, %c0_0] : memref<16x6xf32, #tpu.memory_space<vmem>>, vector<16x6xf32>
    %1 = math.sin %0 : vector<16x6xf32>
    %2 = math.cos %0 : vector<16x6xf32>
    %3 = tpu.concatenate %0, %1, %2 in 1 : vector<16x6xf32>, vector<16x6xf32>, vector<16x6xf32> -> vector<16x18xf32>
    %c0_1 = arith.constant 0 : index
    %c0_2 = arith.constant 0 : index
    %4 = vector.load %arg2[%c0_1, %c0_2] : memref<18x32xf32, #tpu.memory_space<vmem>>, vector<18x32xf32>
    %cst = arith.constant dense<0.000000e+00> : vector<16x32xf32>
    %5 = tpu.matmul %3, %4, %cst {dimension_numbers = #tpu.dot_dimension_numbers<[1], [0], [0], [1], [0, 0, 1, 1], [], []>} : vector<16x18xf32>, vector<18x32xf32>, vector<16x32xf32> -> vector<16x32xf32>
    %c0_3 = arith.constant 0 : index
    %c0_4 = arith.constant 0 : index
    %6 = vector.load %arg3[%c0_3, %c0_4] : memref<1x32xf32, #tpu.memory_space<vmem>>, vector<1x32xf32>
    %7 = vector.broadcast %6 : vector<1x32xf32> to vector<16x32xf32>
    %8 = arith.addf %5, %7 : vector<16x32xf32>
    %c0_5 = arith.constant 0 : index
    %c0_6 = arith.constant 0 : index
    %9 = vector.load %arg4[%c0_5, %c0_6] : memref<16x32xf32, #tpu.memory_space<vmem>>, vector<16x32xf32>
    tpu.vector_store %arg4[%c0_5, %c0_6], %8 {strides = array<i32>} : memref<16x32xf32, #tpu.memory_space<vmem>>, vector<16x32xf32>,
    return
  }
  func.func @transform_0(%arg0: i32) -> (i32, i32) {
    %c0_i32 = arith.constant 0 : i32
    %c0_i32_0 = arith.constant 0 : i32
    return %arg0, %c0_i32 : i32, i32
  }
  func.func @transform_1(%arg0: i32) -> (i32, i32) {
    %c0_i32 = arith.constant 0 : i32
    %c0_i32_0 = arith.constant 0 : i32
    %c0_i32_1 = arith.constant 0 : i32
    return %c0_i32, %c0_i32_0 : i32, i32
  }
  func.func @transform_2(%arg0: i32) -> (i32, i32) {
    %c0_i32 = arith.constant 0 : i32
    %c0_i32_0 = arith.constant 0 : i32
    %c0_i32_1 = arith.constant 0 : i32
    return %c0_i32, %c0_i32_0 : i32, i32
  }
  func.func @transform_3(%arg0: i32) -> (i32, i32) {
    %c0_i32 = arith.constant 0 : i32
    %c0_i32_0 = arith.constant 0 : i32
    return %arg0, %c0_i32 : i32, i32
  }
}

</mosaic_0001>

<bundles_post_ra>
// kernel: circular_embedding.1
= control target key start
LH: loop header
LB: loop body
LE: loop exit
PB: predicated region body
PF: predicated region fallthrough
CT: control target
= control target key end

     0   :  { %s779_s0 = inlined_call_operand.vmem [shape: f32[16,6], index: 0, kind: input, shape index: {}]   ;;  %s780_s1 = inlined_call_operand.vmem [shape: f32[18,32], index: 1, kind: input, shape index: {}]   ;;  %s781_s2 = inlined_call_operand.vmem [shape: f32[1,32], index: 2, kind: input, shape index: {}]   ;;  %s782_s3 = inlined_call_operand.hbm [shape: f32[16,32], index: 3, kind: output, shape index: {}]  }
   0x1   :  { %v691_v0 = vld [vmem:[%s779_s0] sm:$0xff]  ;;  %v700_v5 = vld [vmem:[%s779_s0 + $0x8] sm:$0xff] }
   0x2   :  { %v17_v1 = vand.u32 2147483647, %v691_v0  ;;  %v20_v2 = vand.u32 2139095040, %v691_v0 }
   0x4   :  { %v21_v3 = vshrl.u32 %v20_v2, 23  ;;  %v24_v4 = vand.u32 8388607, %v17_v1 }
   0x5   :  { %8 = vsyncpa [#allocation3], 0  ;;  %v121_v7 = vand.u32 2147483647, %v700_v5  ;;  %v124_v8 = vand.u32 2139095040, %v700_v5  ;;  %vm19_vm14 = vcmp.lt.s32.totalorder %v691_v0, 0 }
   0x6   :  { %v568_v6 = vadd.s32 4294967169, %v21_v3  ;;  %v25_v10 = vor.u32 8388608, %v24_v4  ;;  %v657_v20 = vmov 683565275   ;;  %v658_v22 = vmov 2475754826  }
   0x7   :  { %v125_v11 = vshrl.u32 %v124_v8, 23  ;;  %v128_v14 = vand.u32 8388607, %v121_v7  ;;  %v659_v24 = vmov 2131351028   ;;  %s663_s21 = smov 6  }
   0x8   :  { %v27_v9 = vadd.s32 1, %v568_v6  ;;  %v706_v17 = vshll.u32 %v25_v10, 8  ;;  %v660_v26 = vmov 2102212464   ;;  %v661_v28 = vmov 920167782  }
   0x9   :  { %v572_v13 = vadd.s32 4294967169, %v125_v11  ;;  %v129_v30 = vor.u32 8388608, %v128_v14  ;;  %v662_v36 = vmov 1326507024   ;;  %vm18_vm15 = vcmp.le.f32.partialorder %v17_v1, 0.7853982 }
   0xa   :  { %vm28_vm0 = vcmp.gt.s32.totalorder %v27_v9, 0  ;;  %v453_v1 = vld [vmem:[%s780_s1] sm:$0xff]  ;;  %s664_s22 = smov 12   ;;  %s665_s24 = smov [#allocation2]  }
   0xb   :  { %v29_v12 = vsel %vm28_vm0, %v27_v9, 0  ;;  %v131_v18 = vadd.s32 1, %v572_v13  ;;  %v169_v58 = vshll.u32 %v129_v30, 8  ;;  %vm123_vm0 = vcmp.lt.s32.totalorder %v700_v5, 0  ;;  %s557_s25 = sshll.u32 %s665_s24, 4  ;;  %s558_s25 = int_to_ptr.vmem [resolvable:$true] %s557_s25 }
   0xc   :  { %v30_v15 = vshrl.u32 %v29_v12, 5  ;;  %v31_v16 = vand.u32 31, %v29_v12  ;;  %s633_s26 = scalar_lea.vmem %s558_s25, 256  ;;  %p638_p1 = scmp.lt.s32.totalorder %s558_s25, %s558_s25 }
   0xd   :  { %vm132_vm4 = vcmp.gt.s32.totalorder %v131_v18, 0  ;;  %p634_p0 = scmp.ne.s32.totalorder %s558_s25, %s633_s26  ;;  %p639_p2 = scmp.lt.s32.totalorder %s633_s26, %s633_s26 }
   0xe   :  { %v32_v19 = vsub.s32 32, %v31_v16  ;;  %v34_v21 = vshll.u32 %v657_v20, %v31_v16  ;;  %v37_v23 = vshll.u32 %v658_v22, %v31_v16  ;;  %v40_v25 = vshll.u32 %v659_v24, %v31_v16 }
   0xf   :  { %v43_v27 = vshll.u32 %v660_v26, %v31_v16  ;;  %v46_v29 = vshll.u32 %v661_v28, %v31_v16  ;;  %vm49_vm1 = vcmp.lt.s32.totalorder %v30_v15, 1  ;;  %vm50_vm2 = vcmp.lt.s32.totalorder %v30_v15, 2  ;;  %p640_p3 = por %p639_p2, %p638_p1 }
  0x10   :  { %v33_v31 = vshrl.u32 %v657_v20, %v32_v19  ;;  %v35_v32 = vshrl.u32 %v658_v22, %v32_v19  ;;  %v38_v33 = vshrl.u32 %v659_v24, %v32_v19  ;;  %v41_v34 = vshrl.u32 %v660_v26, %v32_v19 }
  0x11   :  { %v44_v35 = vshrl.u32 %v661_v28, %v32_v19  ;;  %v47_v37 = vshrl.u32 %v662_v36, %v32_v19  ;;  %vm52_vm3 = vcmp.lt.s32.totalorder %v30_v15, 4  ;;  %vm51_vm5 = vcmp.lt.s32.totalorder %v30_v15, 3  ;;  %p641_p4 = pnand %p640_p3, %p634_p0 }
  0x12   :  { %v36_v38 = vor.u32 %v35_v32, %v34_v21  ;;  %v39_v39 = vor.u32 %v38_v33, %v37_v23  ;;  %v42_v40 = vor.u32 %v41_v34, %v40_v25  ;;  %v133_v43 = vsel %vm132_vm4, %v131_v18, 0 }
  0x13   :  { %v45_v41 = vor.u32 %v44_v35, %v43_v27  ;;  %v48_v42 = vor.u32 %v47_v37, %v46_v29  ;;  %v134_v53 = vshrl.u32 %v133_v43, 5  ;;  %v135_v54 = vand.u32 31, %v133_v43 }
  0x14   :  { %v53_v44 = vsel %vm49_vm1, %v33_v31, %v36_v38  ;;  %v54_v45 = vsel %vm52_vm3, %v42_v40, 2102212464  ;;  %v57_v46 = vsel %vm49_vm1, %v36_v38, %v39_v39  ;;  %v61_v47 = vsel %vm49_vm1, %v39_v39, %v42_v40 }
  0x15   :  { %v55_v48 = vsel %vm51_vm5, %v39_v39, %v54_v45  ;;  %v58_v49 = vsel %vm52_vm3, %v45_v41, 920167782  ;;  %v62_v50 = vsel %vm52_vm3, %v48_v42, 1326507024  ;;  %v136_v63 = vsub.s32 32, %v135_v54 }
  0x16   :  { %v59_v51 = vsel %vm51_vm5, %v42_v40, %v58_v49  ;;  %v63_v52 = vsel %vm51_vm5, %v45_v41, %v62_v50  ;;  %v56_v55 = vsel %vm50_vm2, %v53_v44, %v55_v48  ;;  %v138_v2 = vshll.u32 %v657_v20, %v135_v54 }
  0x17   :  { %v60_v56 = vsel %vm50_vm2, %v57_v46, %v59_v51  ;;  %v64_v57 = vsel %vm50_vm2, %v61_v47, %v63_v52  ;;  %v141_v3 = vshll.u32 %v658_v22, %v135_v54  ;;  %v144_v4 = vshll.u32 %v659_v24, %v135_v54 }
  0x18   :  { %v715_v59 = vmul.u32.u64.low %v706_v17, %v64_v57  ;;  %v716_v60 = vmul.u32.u64.high %v706_v17, %v64_v57, %v715_v59  ;;  %v719_v61 = vmul.u32.u64.low %v706_v17, %v60_v56  ;;  %v720_v62 = vmul.u32.u64.high %v706_v17, %v60_v56, %v719_v61 }
  0x19   :  { %v72_v6 = vmul.u32 %v706_v17, %v56_v55  ;;  %v147_v8 = vshll.u32 %v660_v26, %v135_v54  ;;  %v150_v9 = vshll.u32 %v661_v28, %v135_v54  ;;  %vm153_vm6 = vcmp.lt.s32.totalorder %v134_v53, 1 }
  0x1a   :  { %v137_v10 = vshrl.u32 %v657_v20, %v136_v63  ;;  %v139_v11 = vshrl.u32 %v658_v22, %v136_v63  ;;  %v142_v12 = vshrl.u32 %v659_v24, %v136_v63  ;;  %v145_v13 = vshrl.u32 %v660_v26, %v136_v63 }
  0x1b   :  { %vm74_vm7 = vc.u32 %v716_v60, %v719_v61  ;;  %v75_v14 = vadd.s32 1, %v720_v62  ;;  %v148_v15 = vshrl.u32 %v661_v28, %v136_v63  ;;  %vm154_vm8 = vcmp.lt.s32.totalorder %v134_v53, 2 }
  0x1c   :  { %v140_v16 = vor.u32 %v139_v11, %v138_v2  ;;  %v143_v18 = vor.u32 %v142_v12, %v141_v3  ;;  %v146_v19 = vor.u32 %v145_v13, %v144_v4  ;;  %v151_v21 = vshrl.u32 %v662_v36, %v136_v63 }
  0x1d   :  { %v76_v23 = vsel %vm74_vm7, %v75_v14, %v720_v62  ;;  %v149_v17 = vor.u32 %v148_v15, %v147_v8  ;;  %vm155_vm9 = vcmp.lt.s32.totalorder %v134_v53, 3  ;;  %vm156_vm10 = vcmp.lt.s32.totalorder %v134_v53, 4 }
  0x1e   :  { %v77_v25 = vadd.s32 %v76_v23, %v72_v6  ;;  %v152_v20 = vor.u32 %v151_v21, %v150_v9  ;;  %v157_v22 = vsel %vm153_vm6, %v137_v10, %v140_v16  ;;  %v158_v24 = vsel %vm156_vm10, %v146_v19, 2102212464 }
  0x1f   :  { %v159_v26 = vsel %vm155_vm9, %v143_v18, %v158_v24  ;;  %v161_v27 = vsel %vm153_vm6, %v140_v16, %v143_v18  ;;  %v162_v29 = vsel %vm156_vm10, %v149_v17, 920167782  ;;  %v165_v28 = vsel %vm153_vm6, %v143_v18, %v146_v19 }
  0x20   :  { %v78_v30 = vadd.s32 536870912, %v77_v25  ;;  %v163_v31 = vsel %vm155_vm9, %v146_v19, %v162_v29  ;;  %v166_v32 = vsel %vm156_vm10, %v152_v20, 1326507024  ;;  %v160_v33 = vsel %vm154_vm8, %v157_v22, %v159_v26 }
  0x21   :  { %v164_v34 = vsel %vm154_vm8, %v161_v27, %v163_v31  ;;  %v167_v35 = vsel %vm155_vm9, %v149_v17, %v166_v32  ;;  %v176_v43 = vmul.u32 %v169_v58, %v160_v33  ;;  %v73_v55 = vadd.s32 %v719_v61, %v716_v60  ;;  %v454_v33 = vld [vmem:[%s780_s1 + $0x8] sm:$0xff] }
  0x22   :  { %v79_v36 = vshrl.u32 %v78_v30, 30  ;;  %v168_v37 = vsel %vm154_vm8, %v165_v28, %v167_v35  ;;  %v732_v38 = vmul.u32.u64.low %v169_v58, %v164_v34  ;;  %v733_v39 = vmul.u32.u64.high %v169_v58, %v164_v34, %v732_v38 }
  0x23   :  { %v735_v40 = vmul.u32.u64.low %v169_v58, %v168_v37  ;;  %v736_v41 = vmul.u32.u64.high %v169_v58, %v168_v37, %v735_v40  ;;  %v602_v35 = vpack.c.bf16 %v454_v33, %v453_v1  ;;  %vm122_vm1 = vcmp.le.f32.partialorder %v121_v7, 0.7853982 }
  0x24   :  { %v80_v42 = vshll.u32 %v79_v36, 30  ;;  %v179_v45 = vadd.s32 1, %v733_v39  ;;  %v103_v14 = vsub.s32 4, %v79_v36  ;;  %vm109_vm8 = vweird.f32 %v691_v0 }
  0x25   :  { %vm178_vm11 = vc.u32 %v736_v41, %v732_v38  ;;  %v177_v60 = vadd.s32 %v732_v38, %v736_v41  ;;  %603 = vmatprep.subr.bf16.mxu0 %v602_v35  ;;  %vm470_vm9 = vcmask 1041408  }
  0x26   :  { %v81_v44 = vsub.s32 %v77_v25, %v80_v42  ;;  %v180_v47 = vsel %vm178_vm11, %v179_v45, %v733_v39  ;;  %v104_v23 = vsel %vm19_vm14, %v103_v14, %v79_v36  ;;  %605 = vmatpush3.bf16.msra.mxu0 %v602_v35 }
  0x27   :  { %v181_v48 = vadd.s32 %v180_v47, %v176_v43  ;;  %v106_v24 = vsel %vm18_vm15, 0, %v104_v23 }
  0x28   :  { %v83_v46 = vsub.s32 0, %v81_v44  ;;  %v110_v30 = vadd.s32 3, %v106_v24  ;;  %v318_v37 = vand.u32 3, %v106_v24 }
  0x29   :  { %v182_v50 = vadd.s32 536870912, %v181_v48 }
  0x2a   :  { %v569_v49 = vmin.u32 %v83_v46, %v81_v44  ;;  %v111_v36 = vand.u32 3, %v110_v30  ;;  %vm323_vm3 = vcmp.eq.s32.totalorder %v318_v37, 2  ;;  %vm320_vm5 = vcmp.eq.s32.totalorder %v318_v37, 0 }
  0x2b   :  { %v183_v52 = vshrl.u32 %v182_v50, 30  ;;  %vm319_vm7 = vcmp.lt.s32.totalorder %v318_v37, 2 }
  0x2c   :  { %v85_v51 = vclz %v569_v49  ;;  %vm116_vm2 = vcmp.eq.s32.totalorder %v111_v36, 2  ;;  %vm113_vm4 = vcmp.eq.s32.totalorder %v111_v36, 0  ;;  %vm112_vm6 = vcmp.lt.s32.totalorder %v111_v36, 2 }
  0x2d   :  { %v184_v54 = vshll.u32 %v183_v52, 30  ;;  %v207_v32 = vsub.s32 4, %v183_v52 }
  0x2e   :  { %v570_v53 = vadd.s32 4294967294, %v85_v51  ;;  %v455_v51 = vld [vmem:[%s780_s1 + $0x10] sm:$0x3] }
  0x2f   :  { %v185_v57 = vsub.s32 %v181_v48, %v184_v54  ;;  %v208_v39 = vsel %vm123_vm0, %v207_v32, %v183_v52  ;;  %597 = vmatprep.subr.msk.mxu0 %vm470_vm9, %v455_v51 }
  0x30   :  { %vm571_vm12 = vcmp.lt.s32.totalorder %v570_v53, 0  ;;  %v210_v43 = vsel %vm122_vm1, 0, %v208_v39  ;;  %598 = vmatpush3.msk.msra.mxu0 %vm470_vm9, %v455_v51 }
  0x31   :  { %v88_v56 = vsel %vm571_vm12, 0, %v570_v53  ;;  %v187_v63 = vsub.s32 0, %v185_v57  ;;  %v214_v48 = vadd.s32 3, %v210_v43 }
  0x32   :  { %v89_v58 = vsub.s32 32, %v88_v56  ;;  %v90_v59 = vshll.u32 %v81_v44, %v88_v56  ;;  %v93_v62 = vsub.s32 4294967266, %v88_v56 }
  0x33   :  { %v573_v4 = vmin.u32 %v187_v63, %v185_v57  ;;  %v215_v56 = vand.u32 3, %v214_v48 }
  0x34   :  { %v91_v2 = vshrl.u32 %v73_v55, %v89_v58  ;;  %v94_v3 = vadd.s32 127, %v93_v62 }
  0x35   :  { %v189_v9 = vclz %v573_v4  ;;  %vm220_vm10 = vcmp.eq.s32.totalorder %v215_v56, 2  ;;  %vm217_vm12 = vcmp.eq.s32.totalorder %v215_v56, 0 }
  0x36   :  { %v92_v6 = vor.u32 %v91_v2, %v90_v59  ;;  %v95_v8 = vshll.u32 %v94_v3, 23 }
  0x37   :  { %v574_v12 = vadd.s32 4294967294, %v189_v9 }
  0x38   :  { %v96_v10 = vor.u32 4788187, %v95_v8  ;;  %v99_v11 = vcvt.s32.f32 %v92_v6 }
  0x39   :  { %vm575_vm13 = vcmp.lt.s32.totalorder %v574_v12, 0 }
  0x3a   :  { %v97_v13 = vand.u32 2147483647, %v96_v10  ;;  %v192_v15 = vsel %vm575_vm13, 0, %v574_v12 }
  0x3b   :  { %v193_v16 = vsub.s32 32, %v192_v15  ;;  %v194_v18 = vshll.u32 %v185_v57, %v192_v15  ;;  %v197_v19 = vsub.s32 4294967266, %v192_v15  ;;  %v421_v57 = vand.u32 3, %v210_v43 }
  0x3c   :  { %v100_v61 = vmul.f32 %v99_v11, %v97_v13 }
  0x3d   :  { %v195_v17 = vshrl.u32 %v177_v60, %v193_v16  ;;  %v198_v25 = vadd.s32 127, %v197_v19  ;;  %vm426_vm11 = vcmp.eq.s32.totalorder %v421_v57, 2  ;;  %vm423_vm13 = vcmp.eq.s32.totalorder %v421_v57, 0  ;;  %v584_v19 = vld [vmem:[%s781_s2] ss:$0 sm:$0xff] }
  0x3e   :  { %v101_v21 = vxor.u32 2147483648, %v100_v61 }
  0x3f   :  { %v196_v26 = vor.u32 %v195_v17, %v194_v18  ;;  %v199_v27 = vshll.u32 %v198_v25, 23 }
  0x40   :  { %v102_v20 = vsel %vm19_vm14, %v101_v21, %v100_v61  ;;  %vm216_vm14 = vcmp.lt.s32.totalorder %v215_v56, 2 }
  0x41   :  { %v105_v22 = vsel %vm18_vm15, %v691_v0, %v102_v20  ;;  %v200_v29 = vor.u32 4788187, %v199_v27  ;;  %v203_v28 = vcvt.s32.f32 %v196_v26  ;;  %vm422_vm15 = vcmp.lt.s32.totalorder %v421_v57, 2 }
  0x42   :  { %625 = vcosq.f32 %v105_v22 }
  0x43   :  { %627 = vsinq.f32 %v105_v22  ;;  %v201_v31 = vand.u32 2147483647, %v200_v29 }
  0x45   :  { %v204_v34 = vmul.f32 %v203_v28, %v201_v31 }
  0x47   :  { %v205_v38 = vxor.u32 2147483648, %v204_v34 }
  0x49   :  { %v206_v40 = vsel %vm123_vm0, %v205_v38, %v204_v34  ;;  %vm213_vm0 = vweird.f32 %v700_v5 }
  0x4a   :  { %v209_v42 = vsel %vm122_vm1, %v700_v5, %v206_v40  ;;  %vm447_vm1 = vcmask 48128  }
  0x4b   :  { %629 = vcosq.f32 %v209_v42 }
  0x4c   :  { %v626_v41 = vpop.eup %625  ;;  %631 = vsinq.f32 %v209_v42 }
  0x4d   :  { %v628_v44 = vpop.eup %627  ;;  %v117_v45 = vxor.u32 2147483648, %v626_v41 }
  0x4e   :  { %v114_v46 = vxor.u32 2147483648, %v628_v44 }
  0x4f   :  { %v118_v7 = vsel %vm116_vm2, %v117_v45, %v628_v44  ;;  %v325_v47 = vsel %vm323_vm3, %v117_v45, %v628_v44  ;;  %vm450_vm2 = vcmask 97280   ;;  %vm463_vm3 = vcmask 146432  }
  0x50   :  { %v115_v49 = vsel %vm113_vm4, %v626_v41, %v114_v46  ;;  %v322_v50 = vsel %vm320_vm5, %v626_v41, %v114_v46  ;;  %vm549_vm4 = vcmask 261120  }
  0x51   :  { %v119_v52 = vsel %vm112_vm6, %v115_v49, %v118_v7  ;;  %v326_v53 = vsel %vm319_vm7, %v322_v50, %v325_v47 }
  0x52   :  { %v120_v54 = vsel %vm109_vm8, nan, %v119_v52  ;;  %v327_v55 = vsel %vm109_vm8, nan, %v326_v53 }
  0x53   :  { %433 = vrot.lane.b32.xlu0 %v120_v54, %s663_s21  ;;  %441 = vrot.lane.b32.xlu1 %v327_v55, %s664_s22 }
  0x55   :  { %v630_v58 = vpop.eup %629 }
  0x56   :  { %v632_v59 = vpop.eup %631  ;;  %v221_v62 = vxor.u32 2147483648, %v630_v58 }
  0x57   :  { %v218_v63 = vxor.u32 2147483648, %v632_v59 }
  0x58   :  { %v222_v2 = vsel %vm220_vm10, %v221_v62, %v632_v59  ;;  %v428_v3 = vsel %vm426_vm11, %v221_v62, %v632_v59 }
  0x59   :  { %v219_v4 = vsel %vm217_vm12, %v630_v58, %v218_v63  ;;  %v425_v6 = vsel %vm423_vm13, %v630_v58, %v218_v63 }
  0x5a   :  { %v223_v8 = vsel %vm216_vm14, %v219_v4, %v222_v2  ;;  %v429_v9 = vsel %vm422_vm15, %v425_v6, %v428_v3 }
  0x5b   :  { %v224_v10 = vsel %vm213_vm0, nan, %v223_v8  ;;  %v430_v11 = vsel %vm213_vm0, nan, %v429_v9 }
  0x5c   :  { %435 = vrot.lane.b32.xlu0 %v224_v10, %s663_s21  ;;  %443 = vrot.lane.b32.xlu1 %v430_v11, %s664_s22 }
  0xc5   :  { %v434_v12 = vpop.permute.xlu0 %433  ;;  %v442_v13 = vpop.permute.xlu1 %441 }
  0xc6   :  { %v448_v14 = vsel %vm447_vm1, %v691_v0, %v434_v12 }
  0xc7   :  { %v451_v60 = vsel %vm450_vm2, %v448_v14, %v442_v13 }
  0xc8   :  { %599 = vmatprep.mubr.msk.f32.mxu0 %vm463_vm3, %v451_v60 }
  0xce   :  { %v436_v61 = vpop.permute.xlu0 %435  ;;  %v444_v15 = vpop.permute.xlu1 %443 }
  0xcf   :  { %v449_v16 = vsel %vm447_vm1, %v700_v5, %v436_v61 }
  0xd0   :  { %v452_v18 = vsel %vm450_vm2, %v449_v16, %v444_v15 }
  0xd1   :  { %600 = vmatmul.mubr.msk.f32.vlgmr.msra.gmra.mrb[0].mxu0 %vm463_vm3, %v452_v18 }
 0x1a4   :  { %v601_v21 = vpop.f32.mrb[0].mxu0 }
 0x1a5   :  { %v546_v23 = vadd.f32 %v601_v21, %v584_v19  ;;  %v540_v17 = vpop.f32.mrb[1].mxu0 }
 0x1a6   :  { %v541_v0 = vadd.f32 %v584_v19, %v540_v17 }
 0x1a7   :  { %551 = vst.msk [vmem:[#allocation2 + $0x8] sm:$0xff] %vm549_vm4, %v546_v23 }
 0x1a8   :  { %550 = vst.msk [vmem:[#allocation2] sm:$0xff] %vm549_vm4, %v541_v0 }
 0x1a9   :  { %644 = shalt.err (!%p641_p4)
}
 0x1aa   :  { %s645_s2 = scalar_lea.hbm %s782_s3, 256 }
 0x1ab   :  { %p646_p5 = scmp.ne.s32.totalorder %s782_s3, %s645_s2  ;;  %p649_p6 = scmp.lt.u32.totalorder %s645_s2, %s782_s3 }
 0x1ad   :  { %p651_p7 = pnand %p649_p6, %p646_p5 }
 0x1af   :  { %654 = shalt.err (!%p651_p7)
}
 0x1b0   :  { %s666_s6 = smov 128   ;;  %s667_s7 = smov 8  }
 0x1b1   :  { %563 = dma.vmem_to_hbm [thread:$0]  %s558_s25, 256, %s782_s3, [#allocation3], %s666_s6, %s666_s6, %s667_s7  }
 0x1b2   :  { %655 = dma.done.wait [#allocation3], 256  }
 0x1b3   :  { %656 = vsyncadd [#allocation3], 4294967040 }
 0x1b4   :  { %567 = vsyncpa [#allocation3], 1 }

</bundles_post_ra>
